<compile_context>
chip_gen: v7x
topology: tpu7x:2x2x1
jax: 0.10.0
libtpu: 0.0.40
codegen_flags: <defaults>
</compile_context>

<pallas_src>
import functools

import numpy as np
import jax
import jax.numpy as jnp
from jax import lax
from jax.experimental import pallas as pl
from jax.experimental.pallas import tpu as pltpu


# ------------------------------ Pallas kernel ------------------------------- #

def _fused_head_kernel(*refs, num_pathways, num_classes, act):
    """One grid step == one batch element.

    refs layout:
      x_0..x_{P-1}   : (C_p, S_in_p)   pathway activations (channels-major)
      pm_0..pm_{P-1} : (S_out, S_in_p) stride-1 avg-pool matrices
      w              : (D, K_pad)      projection weight (transposed, padded)
      b              : (1, K_pad)      projection bias (padded)
      out            : (S_out, K_pad)
    """
    x_refs = refs[:num_pathways]
    p_refs = refs[num_pathways:2 * num_pathways]
    w_ref = refs[2 * num_pathways]
    b_ref = refs[2 * num_pathways + 1]
    o_ref = refs[2 * num_pathways + 2]

    acc = None
    off = 0
    for p in range(num_pathways):
        x = x_refs[p][...]                              # (C_p, S_in_p)
        pm = p_refs[p][...]                             # (S_out, S_in_p)
        # AvgPool3d(stride=1): pooled[o, c] = sum_s pm[o, s] * x[c, s]
        pooled = lax.dot_general(
            pm, x, (((1,), (1,)), ((), ())),
            preferred_element_type=jnp.float32)         # (S_out, C_p)
        cp = x_refs[p].shape[0]
        # Concat-over-channels == sum of per-pathway partial projections:
        # part[o, k] = sum_c pooled[o, c] * W_t[off + c, k]
        part = jnp.dot(
            pooled.astype(w_ref.dtype), w_ref[off:off + cp, :],
            preferred_element_type=jnp.float32)         # (S_out, K_pad)
        acc = part if acc is None else acc + part
        off += cp

    y = acc + b_ref[...].astype(jnp.float32)

    if act == "softmax":                                # nn.Softmax(dim=4)
        if num_classes < y.shape[-1]:
            # Mask padded class columns so they do not perturb max/sum.
            col = lax.broadcasted_iota(jnp.int32, y.shape, 1)
            y = jnp.where(col < num_classes, y, jnp.full_like(y, -1e30))
        m = jnp.max(y, axis=-1, keepdims=True)
        e = jnp.exp(y - m)
        s = jnp.sum(e, axis=-1, keepdims=True)
        # EUP reciprocal.  approx=True is a further (free) micro-opt at large
        # class counts; exact keeps 1e-4 parity with the f32 reference at K=10.
        y = e * pl.reciprocal(s, approx=False)
    elif act == "sigmoid":
        y = jax.nn.sigmoid(y)
    # act == "identity": nothing

    o_ref[...] = y.astype(o_ref.dtype)


# ----------------------------- fused forward -------------------------------- #

@functools.partial(jax.jit,
                   static_argnames=("num_classes", "act", "compute_dtype"))
def _fused_forward(inputs, pmats, w_pad, b_pad, *, num_classes, act,
                   compute_dtype):
    num_pathways = len(inputs)
    B = inputs[0].shape[0]

    # NCDHW -> (B, C, S_in): pure reshape, no transpose / data movement.
    xs = tuple(x.reshape(x.shape[0], x.shape[1], -1).astype(compute_dtype)
               for x in inputs)
    pmats = tuple(pm.astype(compute_dtype) for pm in pmats)
    w_pad = w_pad.astype(compute_dtype)

    S_out = pmats[0].shape[0]
    K_pad = w_pad.shape[1]

    in_specs = [pl.BlockSpec((None, x.shape[1], x.shape[2]),
                             lambda b: (b, 0, 0)) for x in xs]
    in_specs += [pl.BlockSpec(pm.shape, lambda b: (0, 0)) for pm in pmats]
    in_specs += [pl.BlockSpec(w_pad.shape, lambda b: (0, 0)),
                 pl.BlockSpec(b_pad.shape, lambda b: (0, 0))]

    kernel = functools.partial(_fused_head_kernel,
                               num_pathways=num_pathways,
                               num_classes=num_classes,
                               act=act)

    y = pl.pallas_call(
        kernel,
        out_shape=jax.ShapeDtypeStruct((B, S_out, K_pad), jnp.float32),
        grid=(B,),
        in_specs=in_specs,
        out_specs=pl.BlockSpec((None, S_out, K_pad), lambda b: (b, 0, 0)),
        compiler_params=pltpu.CompilerParams(
            dimension_semantics=("parallel",)),   # v7x: shard batch over 2 TCs
    )(*xs, *pmats, w_pad, b_pad)

    # Strip class-axis padding and flatten like torch's x.view(x.shape[0], -1).
    return y[:, :, :num_classes].reshape(B, -1)


# ------------------------------ Python module -------------------------------- #

class ResNetBasicHeadPallas:
    """JAX/Pallas port of ResNetBasicHead (eval-style forward, dropout_rate=0)."""

    _VALID_ACTS = ("identity", "softmax", "sigmoid")

    def __init__(self, dim_in, num_classes, pool_size, dropout_rate=0.0,
                 train_act_func=None, test_act_func=None, key=None,
                 compute_dtype=jnp.float32):
        assert len({len(pool_size), len(dim_in)}) == 1, \
            "pathway dimensions are not consistent."
        self.num_pathways = len(pool_size)
        self.dim_in = [int(d) for d in dim_in]
        self.num_classes = int(num_classes)
        self.pool_size = [tuple(int(v) for v in p) for p in pool_size]
        self.dropout_rate = float(dropout_rate)
        self.train_act = train_act_func or "identity"
        self.test_act = test_act_func or "identity"
        assert self.train_act in self._VALID_ACTS
        assert self.test_act in self._VALID_ACTS
        self.training = False                  # eval mode by default
        # bfloat16 halves HBM traffic / doubles MXU rate on v6e/v7x (f32 accum).
        self.compute_dtype = compute_dtype

        # Deterministic nn.Linear(sum(dim_in), num_classes) parameters.
        key = jax.random.PRNGKey(0) if key is None else key
        kw, kb = jax.random.split(key)
        d = sum(self.dim_in)
        bound = 1.0 / float(np.sqrt(d))
        self.weight = jax.random.uniform(
            kw, (self.num_classes, d), jnp.float32, -bound, bound)
        self.bias = jax.random.uniform(
            kb, (self.num_classes,), jnp.float32, -bound, bound)

        # Built once (not per call): transposed weight, class axis zero-padded
        # to a multiple of 128 so the kernel's only HBM store is lane-dense.
        k_pad = -(-self.num_classes // 128) * 128
        w_t = jnp.transpose(self.weight)                                # (D, K)
        self._w_pad = jnp.pad(w_t, ((0, 0), (0, k_pad - self.num_classes)))
        self._b_pad = jnp.pad(self.bias,
                              (0, k_pad - self.num_classes)).reshape(1, k_pad)

        self._pool_cache = {}   # (pathway, (T, H, W)) -> pooling matrix

    # (S_out, S_in) matrix P such that P @ x_flat == AvgPool3d(pool, stride=1).
    def _pool_matrix(self, pathway, in_dims):
        key = (pathway, tuple(int(v) for v in in_dims))
        if key not in self._pool_cache:
            T, H, W = key[1]
            kt, kh, kw = self.pool_size[pathway]
            To, Ho, Wo = T - kt + 1, H - kh + 1, W - kw + 1
            assert min(To, Ho, Wo) > 0, "pool_size larger than input"
            pmat = np.zeros((To * Ho * Wo, T * H * W), dtype=np.float32)
            inv = 1.0 / float(kt * kh * kw)
            for to in range(To):
                for ho in range(Ho):
                    for wo in range(Wo):
                        o = (to * Ho + ho) * Wo + wo
                        for dt in range(kt):
                            for dh in range(kh):
                                for dw in range(kw):
                                    s = ((to + dt) * H + (ho + dh)) * W + (wo + dw)
                                    pmat[o, s] = inv
            self._pool_cache[key] = jnp.asarray(pmat)
        return self._pool_cache[key]

    def __call__(self, inputs):
        assert len(inputs) == self.num_pathways, \
            "Input tensor does not contain {} pathway".format(self.num_pathways)

        pmats = tuple(self._pool_matrix(p, inputs[p].shape[2:])
                      for p in range(self.num_pathways))
        assert len({pm.shape[0] for pm in pmats}) == 1, \
            "pooled spatial dims must match across pathways for concat"

        # TODO(synk): dropout with rate > 0 in training mode would need the
        # pltpu PRNG; rate == 0 / eval mode is the identity, as implemented.
        act = self.train_act if self.training else self.test_act

        return _fused_forward(tuple(inputs), pmats, self._w_pad, self._b_pad,
                              num_classes=self.num_classes, act=act,
                              compute_dtype=self.compute_dtype)


# --------------------------- pure-JAX reference ----------------------------- #

def reference_forward(head, inputs):
    pooled = []
    for p, x in enumerate(inputs):
        kt, kh, kw = head.pool_size[p]
        s = lax.reduce_window(
            x, 0.0, lax.add,
            window_dimensions=(1, 1, kt, kh, kw),
            window_strides=(1, 1, 1, 1, 1),
            padding="VALID")
        pooled.append(s / float(kt * kh * kw))
    x = jnp.concatenate(pooled, axis=1)                # (B, D, To, Ho, Wo)
    x = jnp.transpose(x, (0, 2, 3, 4, 1))              # (B, To, Ho, Wo, D)
    y = x @ head.weight.T + head.bias
    act = head.train_act if head.training else head.test_act
    if act == "softmax":
        y = jax.nn.softmax(y, axis=4)
    elif act == "sigmoid":
        y = jax.nn.sigmoid(y)
    return y.reshape(y.shape[0], -1)


# ---------------------------------- main ------------------------------------ #

if __name__ == "__main__":
    key = jax.random.PRNGKey(0)
    k0, k1, kp = jax.random.split(key, 3)

    B = 2
    dim_in = [16, 8]
    num_classes = 10
    # pathway0: (B, 16, T=2, H=8, W=8); pathway1: (B, 8, T=8, H=8, W=8)
    pool_size = [(2, 7, 7), (8, 7, 7)]   # both pool to (1, 2, 2) spatial output

    x0 = jax.random.normal(k0, (B, dim_in[0], 2, 8, 8), jnp.float32)
    x1 = jax.random.normal(k1, (B, dim_in[1], 8, 8, 8), jnp.float32)

    head = ResNetBasicHeadPallas(dim_in, num_classes, pool_size,
                                 dropout_rate=0.0,
                                 train_act_func=None,
                                 test_act_func="softmax",
                                 key=kp)

    out = jax.block_until_ready(head([x0, x1]))
    ref = reference_forward(head, [x0, x1])
    np.testing.assert_allclose(np.asarray(out), np.asarray(ref),
                               rtol=1e-4, atol=1e-4)
    assert out.shape == (B, 1 * 2 * 2 * num_classes)

    # Second call hits the cached pool matrices / jit cache (no host rebuild).
    out2 = jax.block_until_ready(head([x0, x1]))
    np.testing.assert_allclose(np.asarray(out2), np.asarray(ref),
                               rtol=1e-4, atol=1e-4)

    # Identity activation path as well.
    head.test_act = "identity"
    out_id = jax.block_until_ready(head([x0, x1]))
    ref_id = reference_forward(head, [x0, x1])
    np.testing.assert_allclose(np.asarray(out_id), np.asarray(ref_id),
                               rtol=1e-4, atol=1e-4)

    print("KERNEL_OK")
</pallas_src>

<mosaic_0001>
module attributes {stable_mosaic.version = 11 : i64} {
  func.func @_fused_head_kernel(%arg0: i32, %arg1: memref<1x16x128xf32, #tpu.memory_space<vmem>>, %arg2: memref<1x8x512xf32, #tpu.memory_space<vmem>>, %arg3: memref<4x128xf32, #tpu.memory_space<vmem>>, %arg4: memref<4x512xf32, #tpu.memory_space<vmem>>, %arg5: memref<24x128xf32, #tpu.memory_space<vmem>>, %arg6: memref<1x128xf32, #tpu.memory_space<vmem>>, %arg7: memref<1x4x128xf32, #tpu.memory_space<vmem>>) attributes {dimension_semantics = [#tpu.dimension_semantics<parallel>], iteration_bounds = array<i64: 2>, scalar_prefetch = 0 : i64, scratch_operands = 0 : i64, tpu.core_type = #tpu.core_type<tc>, window_params = [{transform_indices = @transform_0, window_bounds = array<i64: 1, 16, 128>}, {transform_indices = @transform_1, window_bounds = array<i64: 1, 8, 512>}, {pipeline_mode = #tpu.pipeline_mode<synchronous>, transform_indices = @transform_2, window_bounds = array<i64: 4, 128>}, {pipeline_mode = #tpu.pipeline_mode<synchronous>, transform_indices = @transform_3, window_bounds = array<i64: 4, 512>}, {pipeline_mode = #tpu.pipeline_mode<synchronous>, transform_indices = @transform_4, window_bounds = array<i64: 24, 128>}, {pipeline_mode = #tpu.pipeline_mode<synchronous>, transform_indices = @transform_5, window_bounds = array<i64: 1, 128>}, {transform_indices = @transform_6, window_bounds = array<i64: 1, 4, 128>}]} {
    %c0 = arith.constant 0 : index
    %c0_0 = arith.constant 0 : index
    %c0_1 = arith.constant 0 : index
    %0 = vector.load %arg1[%c0, %c0_0, %c0_1] : memref<1x16x128xf32, #tpu.memory_space<vmem>>, vector<1x16x128xf32>
    %1 = vector.shape_cast %0 : vector<1x16x128xf32> to vector<16x128xf32>
    %c0_2 = arith.constant 0 : index
    %c0_3 = arith.constant 0 : index
    %2 = vector.load %arg3[%c0_2, %c0_3] : memref<4x128xf32, #tpu.memory_space<vmem>>, vector<4x128xf32>
    %cst = arith.constant dense<0.000000e+00> : vector<4x16xf32>
    %3 = tpu.matmul %2, %1, %cst {dimension_numbers = #tpu.dot_dimension_numbers<[1], [1], [0], [0], [0, 0, 1, 0], [], []>} : vector<4x128xf32>, vector<16x128xf32>, vector<4x16xf32> -> vector<4x16xf32>
    %c0_4 = arith.constant 0 : index
    %c0_5 = arith.constant 0 : index
    %4 = vector.load %arg5[%c0_4, %c0_5] : memref<24x128xf32, #tpu.memory_space<vmem>>, vector<16x128xf32>
    %cst_6 = arith.constant dense<0.000000e+00> : vector<4x128xf32>
    %5 = tpu.matmul %3, %4, %cst_6 {dimension_numbers = #tpu.dot_dimension_numbers<[1], [0], [0], [1], [0, 0, 1, 1], [], []>} : vector<4x16xf32>, vector<16x128xf32>, vector<4x128xf32> -> vector<4x128xf32>
    %c0_7 = arith.constant 0 : index
    %c0_8 = arith.constant 0 : index
    %c0_9 = arith.constant 0 : index
    %6 = vector.load %arg2[%c0_7, %c0_8, %c0_9] : memref<1x8x512xf32, #tpu.memory_space<vmem>>, vector<1x8x512xf32>
    %7 = vector.shape_cast %6 : vector<1x8x512xf32> to vector<8x512xf32>
    %c0_10 = arith.constant 0 : index
    %c0_11 = arith.constant 0 : index
    %8 = vector.load %arg4[%c0_10, %c0_11] : memref<4x512xf32, #tpu.memory_space<vmem>>, vector<4x512xf32>
    %cst_12 = arith.constant dense<0.000000e+00> : vector<4x8xf32>
    %9 = tpu.matmul %8, %7, %cst_12 {dimension_numbers = #tpu.dot_dimension_numbers<[1], [1], [0], [0], [0, 0, 1, 0], [], []>} : vector<4x512xf32>, vector<8x512xf32>, vector<4x8xf32> -> vector<4x8xf32>
    %c16 = arith.constant 16 : index
    %c0_13 = arith.constant 0 : index
    %10 = vector.load %arg5[%c16, %c0_13] : memref<24x128xf32, #tpu.memory_space<vmem>>, vector<8x128xf32>
    %cst_14 = arith.constant dense<0.000000e+00> : vector<4x128xf32>
    %11 = tpu.matmul %9, %10, %cst_14 {dimension_numbers = #tpu.dot_dimension_numbers<[1], [0], [0], [1], [0, 0, 1, 1], [], []>} : vector<4x8xf32>, vector<8x128xf32>, vector<4x128xf32> -> vector<4x128xf32>
    %12 = arith.addf %5, %11 : vector<4x128xf32>
    %c0_15 = arith.constant 0 : index
    %c0_16 = arith.constant 0 : index
    %13 = vector.load %arg6[%c0_15, %c0_16] : memref<1x128xf32, #tpu.memory_space<vmem>>, vector<1x128xf32>
    %14 = vector.broadcast %13 : vector<1x128xf32> to vector<4x128xf32>
    %15 = arith.addf %12, %14 : vector<4x128xf32>
    %16 = tpu.iota {dimensions = array<i32: 1>} : vector<4x128xi32>
    %c10_i32 = arith.constant 10 : i32
    %17 = vector.broadcast %c10_i32 : i32 to vector<4x128xi32>
    %18 = arith.cmpi slt, %16, %17 : vector<4x128xi32>
    %cst_17 = arith.constant -1.000000e+30 : f32
    %19 = vector.broadcast %cst_17 : f32 to vector<4x128xf32>
    %20 = arith.select %18, %15, %19 : vector<4x128xi1>, vector<4x128xf32>
    %cst_18 = arith.constant dense<0xFF800000> : vector<4xf32>
    %21 = vector.multi_reduction <maximumf>, %20, %cst_18 [1] : vector<4x128xf32> to vector<4xf32>
    %22 = vector.shape_cast %21 : vector<4xf32> to vector<4x1xf32>
    %23 = vector.broadcast %22 : vector<4x1xf32> to vector<4x128xf32>
    %24 = arith.subf %20, %23 : vector<4x128xf32>
    %25 = math.exp %24 : vector<4x128xf32>
    %cst_19 = arith.constant dense<0.000000e+00> : vector<4xf32>
    %26 = vector.multi_reduction <add>, %25, %cst_19 [1] : vector<4x128xf32> to vector<4xf32>
    %27 = vector.shape_cast %26 : vector<4xf32> to vector<4x1xf32>
    %28 = tpu.reciprocal %27 : vector<4x1xf32> -> vector<4x1xf32>
    %29 = vector.broadcast %28 : vector<4x1xf32> to vector<4x128xf32>
    %30 = arith.mulf %25, %29 : vector<4x128xf32>
    %c0_20 = arith.constant 0 : index
    %c0_21 = arith.constant 0 : index
    %c0_22 = arith.constant 0 : index
    %31 = vector.load %arg7[%c0_20, %c0_21, %c0_22] : memref<1x4x128xf32, #tpu.memory_space<vmem>>, vector<1x4x128xf32>
    %32 = vector.shape_cast %31 : vector<1x4x128xf32> to vector<4x128xf32>
    %33 = vector.shape_cast %30 : vector<4x128xf32> to vector<1x4x128xf32>
    tpu.vector_store %arg7[%c0_20, %c0_21, %c0_22], %33 {strides = array<i32>} : memref<1x4x128xf32, #tpu.memory_space<vmem>>, vector<1x4x128xf32>,
    return
  }
  func.func @transform_0(%arg0: i32) -> (i32, i32, i32) {
    %c0_i32 = arith.constant 0 : i32
    %c0_i32_0 = arith.constant 0 : i32
    %c0_i32_1 = arith.constant 0 : i32
    return %arg0, %c0_i32, %c0_i32_0 : i32, i32, i32
  }
  func.func @transform_1(%arg0: i32) -> (i32, i32, i32) {
    %c0_i32 = arith.constant 0 : i32
    %c0_i32_0 = arith.constant 0 : i32
    %c0_i32_1 = arith.constant 0 : i32
    return %arg0, %c0_i32, %c0_i32_0 : i32, i32, i32
  }
  func.func @transform_2(%arg0: i32) -> (i32, i32) {
    %c0_i32 = arith.constant 0 : i32
    %c0_i32_0 = arith.constant 0 : i32
    %c0_i32_1 = arith.constant 0 : i32
    return %c0_i32, %c0_i32_0 : i32, i32
  }
  func.func @transform_3(%arg0: i32) -> (i32, i32) {
    %c0_i32 = arith.constant 0 : i32
    %c0_i32_0 = arith.constant 0 : i32
    %c0_i32_1 = arith.constant 0 : i32
    return %c0_i32, %c0_i32_0 : i32, i32
  }
  func.func @transform_4(%arg0: i32) -> (i32, i32) {
    %c0_i32 = arith.constant 0 : i32
    %c0_i32_0 = arith.constant 0 : i32
    %c0_i32_1 = arith.constant 0 : i32
    return %c0_i32, %c0_i32_0 : i32, i32
  }
  func.func @transform_5(%arg0: i32) -> (i32, i32) {
    %c0_i32 = arith.constant 0 : i32
    %c0_i32_0 = arith.constant 0 : i32
    %c0_i32_1 = arith.constant 0 : i32
    return %c0_i32, %c0_i32_0 : i32, i32
  }
  func.func @transform_6(%arg0: i32) -> (i32, i32, i32) {
    %c0_i32 = arith.constant 0 : i32
    %c0_i32_0 = arith.constant 0 : i32
    %c0_i32_1 = arith.constant 0 : i32
    return %arg0, %c0_i32, %c0_i32_0 : i32, i32, i32
  }
}

</mosaic_0001>

<bundles_post_ra>
// kernel: _fused_forward.1
= control target key start
LH: loop header
LB: loop body
LE: loop exit
PB: predicated region body
PF: predicated region fallthrough
CT: control target
= control target key end

     0   :  { %s851_s21 = smov 0   ;;  %s900_s0 = inlined_call_operand.vmem [shape: f32[2,16,128], index: 0, kind: input, shape index: {}]   ;;  %s901_s1 = inlined_call_operand.vmem [shape: f32[2,8,512], index: 1, kind: input, shape index: {}]   ;;  %s902_s2 = inlined_call_operand.vmem [shape: f32[4,128], index: 2, kind: input, shape index: {}]   ;;  %s903_s3 = inlined_call_operand.vmem [shape: f32[4,512], index: 3, kind: input, shape index: {}]   ;;  %s904_s4 = inlined_call_operand.vmem [shape: f32[24,128], index: 4, kind: input, shape index: {}]   ;;  %s905_s5 = inlined_call_operand.vmem [shape: f32[1,128], index: 5, kind: input, shape index: {}]   ;;  %s906_s6 = inlined_call_operand.vmem [shape: f32[2,4,128], index: 6, kind: output, shape index: {}]  }
   0x1 LB: > { %s736_s22 = sadd.s32 4294967295, %s811_s21   ;;  %p740_p0 = scmp.ge.s32.totalorder %s811_s21, 1  ;;  %s811_s21 = sphi %s851_s21, %s16_s21  }
   0x2   : > { %p222_p1 = scmp.lt.s32.totalorder %s811_s21, 3 }
   0x4   : > { %p223_p2 = pnand %p740_p0, %p222_p1 }
   0x5   : > { %p256_p3 = scmp.lt.s32.totalorder (!%p223_p2), %s736_s22, 1  ;;  %v349_v0 = vld [vmem:[%s903_s3] sm:$0xff] (!%p223_p2)  ;;  %v813_v2 = vmov (!%p223_p2), 0.0|0.0   ;;  %vm814_vm0 = vmmov (!%p223_p2), 0   ;;  %v815_v3 = vmov (!%p223_p2), 0.0   ;;  %v350_v4 = vld [vmem:[%s903_s3 + $0x8] sm:$0xff] (!%p223_p2)  ;;  %v654_v22 = vlaneseq (!%p223_p2) }
   0x6   : > { %226 = sbr.rel (%p223_p2) target bundleno = 773 (0x305), region = 44  ;;  %v353_v1 = vcombine.high (!%p223_p2), %v349_v0, %v349_v0  ;;  %780 = vmatprep.subr.bf16.mxu0 (!%p223_p2), %v813_v2  ;;  %765 = vmatprep.mubr.msk.f32.mxu0 (!%p223_p2), %vm814_vm0, %v815_v3  ;;  %v354_v10 = vcombine.high (!%p223_p2), %v350_v4, %v350_v4  ;;  %v343_v13 = vld [vmem:[%s904_s4] sm:$0xff] (!%p223_p2)  ;;  %v344_v14 = vld [vmem:[%s904_s4 + $0x8] sm:$0xff] (!%p223_p2)  ;;  %v497_v16 = vld [vmem:[%s904_s4 + $0x10] sm:$0xff] (!%p223_p2)  ;;  %vm572_vm1 = vcmask (!%p223_p2), 130048   ;;  %vm498_vm2 = vcmask (!%p223_p2), 64512  }
   0x7   : > { %v272_v15 = vld [vmem:[%s902_s2] sm:$0xf] (!%p223_p2)  ;;  %v784_v17 = vpack.c.bf16 (!%p223_p2), %v344_v14, %v343_v13  ;;  %v655_v23 = vand.u32 (!%p223_p2), 127, %v654_v22  ;;  %vm658_vm4 = vcmask (!%p223_p2), 1043456  }
   0x8   : > { %421 = vmatprep.mubr.f32.mxu1 (!%p223_p2), %v353_v1  ;;  %v748_v26 = vld [vmem:[%s905_s5] ss:$0 sm:$0xff] (!%p223_p2) }
   0x9   : > { %vm656_vm3 = vcmp.lt.s32.totalorder (!%p223_p2), %v655_v23, 10 }
   0xd   : > { %s908_s22 = smov (!%p256_p3, %s736_s22), 1 }
   0xe   : > { %s752_s25 = sshll.u32 %s908_s22, 5  ;;  %s751_s7 = sshll.u32 %s908_s22, 4 }
   0xf   : > { %s265_s28 = scalar_lea.vmem %s901_s1, %s752_s25  ;;  %s260_s10 = scalar_lea.vmem %s900_s0, %s751_s7 }
  0x10   : > { %v346_v5 = vld [vmem:[%s265_s28 + $0x8] sm:$0xff]  ;;  %v345_v6 = vld [vmem:[%s265_s28] sm:$0xff]  ;;  %v348_v7 = vld [vmem:[%s265_s28 + $0x18] sm:$0xff]  ;;  %s745_s23 = sshll.u32 %s908_s22, 2 }
  0x11   : > { %357 = vmatprep.subr.mxu1 %v346_v5  ;;  %v270_v8 = vld [vmem:[%s260_s10] sm:$0xff]  ;;  %v271_v9 = vld [vmem:[%s260_s10 + $0x8] sm:$0xff]  ;;  %v347_v12 = vld [vmem:[%s265_s28 + $0x10] sm:$0xff]  ;;  %s269_s26 = scalar_lea.vmem %s906_s6, %s745_s23 }
  0x12   : > { %358 = vmatpush1.xpose.msra.mxu1 %v345_v6  ;;  %v781_v11 = vpack.c.bf16 %v271_v9, %v270_v8 }
  0x13   : > { %427 = vmatprep.subr.mxu1 %v348_v7 }
  0x14   : > { %782 = vmatpush3.bf16.xpose.msra.mxu0 %v781_v11 }
  0x15   : > { %422 = vmatmul.mubr.f32.vlgmr.msra.gmra.mrb[0].mxu1 %v349_v0  ;;  %768 = vmatprep.subr.mxu0 %v815_v3 }
  0x16   : > { %428 = vmatpush1.xpose.msra.mxu1 %v347_v12  ;;  %491 = vmatprep.mubr.f32.mxu1 %v354_v10 }
  0x17   : > { %783 = vmatprep.subr.bf16.mxu1 %v813_v2 }
  0x1b   : > { %766 = vmatmul.mubr.f32.vlgmr.msra.gmra.mrb[0].mxu0 %v272_v15 }
  0x1c   : > { %769 = vmatpush3.msra.mxu0 %v497_v16  ;;  %770 = vmatprep.mubr.msk.f32.mxu0 %vm814_vm0, %v815_v3 }
  0x1d   : > { %492 = vmatmul.mubr.f32.vlgmr.msra.gmra.mrb[0].mxu1 %v350_v4 }
  0x1e   : > { %785 = vmatpush3.bf16.msra.mxu1 %v784_v17  ;;  %777 = vmatprep.mubr.msk.f32.mxu1 %vm814_vm0, %v815_v3 }
  0xee   : > { %v339_v18 = vpop.f32.mrb[0].mxu0 }
  0xef   : > { %v767_v20 = vpop.f32.mrb[1].mxu0  ;;  %778 = vmatmul.mubr.msk.f32.vlgmr.msra.gmra.mrb[2].mxu1 %vm572_vm1, %v339_v18 }
  0xf0   : > { %v493_v19 = vpop.f32.mrb[0].mxu1 }
  0xf1   : > { %v495_v21 = vpop.f32.mrb[1].mxu1  ;;  %771 = vmatmul.mubr.msk.f32.vlgmr.msra.gmra.mrb[2].mxu0 %vm498_vm2, %v493_v19 }
 0x1c2   : > { %v642_v24 = vpop.f32.mrb[2].mxu1 }
 0x1c3   : > { %v779_v27 = vpop.f32.mrb[3].mxu1 }
 0x1c4   : > { %v568_v25 = vpop.f32.mrb[2].mxu0 }
 0x1c5   : > { %v643_v28 = vadd.f32 %v642_v24, %v568_v25  ;;  %v772_v29 = vpop.f32.mrb[3].mxu0 }
 0x1c7   : > { %v653_v30 = vadd.f32 %v748_v26, %v643_v28 }
 0x1c9   : > { %v657_v31 = vsel %vm656_vm3, %v653_v30, -1e+30 }
 0x1ca   : > { %v659_v32 = vsel %vm658_vm4, %v657_v31, -inf }
 0x1cb   : > { %660 = vmax.xlane.f32.xlu0 %v659_v32 }
 0x258   : > { %v661_v33 = vpop.xlane.xlu0 %660 }
 0x259   : > { %v662_v34 = vsub.f32 %v657_v31, %v661_v33 }
 0x25b   : > { %v663_v35 = vmul.f32 1.442695, %v662_v34 }
 0x25d   : > { %801 = vpow2.f32 %v663_v35 }
 0x267   : > { %v802_v36 = vpop.eup %801 }
 0x268   : > { %v665_v37 = vsel %vm658_vm4, %v802_v36, 0.0 }
 0x269   : > { %666 = vadd.xlane.f32.xlu0 %v665_v37 }
 0x2f6   : > { %v667_v38 = vpop.xlane.xlu0 %666 }
 0x2f7   : > { %803 = vrcp.f32 %v667_v38 }
 0x301   : > { %v804_v39 = vpop.eup %803 }
 0x302   : > { %v669_v40 = vmul.f32 %v804_v39, %v802_v36 }
 0x304   : > { %670 = vst [vmem:[%s269_s26] sm:$0xf] %v669_v40 }
 0x305 PF: > { %s16_s21 = sadd.s32 1, %s811_s21  }
 0x306   : > { %p13_p4 = scmp.ge.s32.totalorder %s16_s21, 4  }
 0x308   :  { %15 = sbr.rel (!%p13_p4) target bundleno = 1 (0x1), region = 77 }

</bundles_post_ra>
